<compile_context>
chip_gen: v7x
topology: tpu7x:2x2x1
jax: 0.10.0
libtpu: 0.0.40
codegen_flags: <defaults>
</compile_context>

<pallas_src>
import jax
import jax.numpy as jnp
import numpy as np
from jax.experimental import pallas as pl
from jax.experimental.pallas import tpu as pltpu


def _round_up(n, m):
    return ((n + m - 1) // m) * m


def _rmm_kernel(xi_ref, xj_ref, out_ref):
    # xi_ref: [D, K, TN], xj_ref: [D, L, TN], out_ref: [K, L, TN]
    d_count = xi_ref.shape[0]

    # d = 0 initializes the accumulator (saves a zeros fill).
    diff = (xi_ref[0][:, None, :] - xj_ref[0][None, :, :]).astype(jnp.float32)
    acc = diff * diff
    for d in range(1, d_count):                       # D tiny -> static unroll
        diff = (xi_ref[d][:, None, :] - xj_ref[d][None, :, :]).astype(jnp.float32)
        acc = acc + diff * diff

    out_ref[...] = jnp.sqrt(acc).astype(out_ref.dtype)  # [K, L, TN] lane-dense


def relative_measure_map(particles, edges, *, edge_tile=512):
    """particles: [num_nodes, K, D]; edges: [N, 2] int -> ratios: [N, K*K, 1]."""
    num_nodes, K, D = particles.shape
    L = K
    N = edges.shape[0]
    dt = particles.dtype

    # Edge tile: multiple of 128 (lane-dense), capped by edge_tile.
    TN = min(edge_tile, _round_up(N, 128))
    Np = _round_up(N, TN)
    if Np > N:
        # Node 0 is always a valid index; padded rows are sliced off at the end.
        pad = jnp.zeros((Np - N, 2), dtype=edges.dtype)
        edges_p = jnp.concatenate([edges, pad], axis=0)
    else:
        edges_p = edges

    # One row-gather per endpoint; put the edge axis last (lane axis).
    xi = jnp.transpose(particles[edges_p[:, 0]], (2, 1, 0))  # [D, K, Np]
    xj = jnp.transpose(particles[edges_p[:, 1]], (2, 1, 0))  # [D, L, Np]

    out = pl.pallas_call(
        _rmm_kernel,
        out_shape=jax.ShapeDtypeStruct((K, L, Np), dt),
        grid=(Np // TN,),
        in_specs=[
            pl.BlockSpec((D, K, TN), lambda t: (0, 0, t)),
            pl.BlockSpec((D, L, TN), lambda t: (0, 0, t)),
        ],
        out_specs=pl.BlockSpec((K, L, TN), lambda t: (0, 0, t)),
        compiler_params=pltpu.CompilerParams(
            dimension_semantics=("parallel",),  # independent edge tiles
        ),
    )(xi, xj)

    # Glue back to the PyTorch output layout [N, K*L, 1].
    ratios = jnp.transpose(out, (2, 0, 1)).reshape(Np, K * L, 1)[:N]
    return ratios


def _reference(particles, edges):
    """Pure-JAX reference with the same semantics (for validation)."""
    xi = particles[edges[:, 0]]                  # [N, K, D]
    xj = particles[edges[:, 1]]                  # [N, L, D]
    diff = xi[:, :, None, :] - xj[:, None, :, :]
    r = jnp.sqrt(jnp.sum(diff * diff, axis=-1))  # [N, K, L]
    n, k, l = r.shape
    return r.reshape(n, k * l, 1)


if __name__ == "__main__":
    key = jax.random.PRNGKey(0)
    num_nodes, K, D = 5, 8, 3

    particles = jax.random.normal(key, (num_nodes, K, D), dtype=jnp.float32)
    edges = jnp.array(
        [[0, 1], [1, 2], [2, 3], [3, 4], [4, 0], [0, 2]], dtype=jnp.int32
    )

    ratios = relative_measure_map(particles, edges)
    jax.block_until_ready(ratios)

    ratios_ref = _reference(particles, edges)
    assert ratios.shape == (edges.shape[0], K * K, 1)
    np.testing.assert_allclose(
        np.asarray(ratios), np.asarray(ratios_ref), rtol=1e-5, atol=1e-5
    )
    print("KERNEL_OK")
</pallas_src>

<mosaic_0001>
module attributes {stable_mosaic.version = 11 : i64} {
  func.func @_rmm_kernel(%arg0: i32, %arg1: memref<3x8x128xf32, #tpu.memory_space<vmem>>, %arg2: memref<3x8x128xf32, #tpu.memory_space<vmem>>, %arg3: memref<8x8x128xf32, #tpu.memory_space<vmem>>) attributes {dimension_semantics = [#tpu.dimension_semantics<parallel>], iteration_bounds = array<i64: 1>, scalar_prefetch = 0 : i64, scratch_operands = 0 : i64, tpu.core_type = #tpu.core_type<tc>, window_params = [{transform_indices = @transform_0, window_bounds = array<i64: 3, 8, 128>}, {transform_indices = @transform_1, window_bounds = array<i64: 3, 8, 128>}, {transform_indices = @transform_2, window_bounds = array<i64: 8, 8, 128>}]} {
    %c0 = arith.constant 0 : index
    %c0_0 = arith.constant 0 : index
    %c0_1 = arith.constant 0 : index
    %0 = vector.load %arg1[%c0, %c0_0, %c0_1] : memref<3x8x128xf32, #tpu.memory_space<vmem>>, vector<1x8x128xf32>
    %1 = vector.shape_cast %0 : vector<1x8x128xf32> to vector<8x128xf32>
    %2 = vector.shape_cast %1 : vector<8x128xf32> to vector<8x1x128xf32>
    %c0_2 = arith.constant 0 : index
    %c0_3 = arith.constant 0 : index
    %c0_4 = arith.constant 0 : index
    %3 = vector.load %arg2[%c0_2, %c0_3, %c0_4] : memref<3x8x128xf32, #tpu.memory_space<vmem>>, vector<1x8x128xf32>
    %4 = vector.shape_cast %3 : vector<1x8x128xf32> to vector<8x128xf32>
    %5 = vector.shape_cast %4 : vector<8x128xf32> to vector<1x8x128xf32>
    %6 = vector.broadcast %2 : vector<8x1x128xf32> to vector<8x8x128xf32>
    %7 = vector.broadcast %5 : vector<1x8x128xf32> to vector<8x8x128xf32>
    %8 = arith.subf %6, %7 : vector<8x8x128xf32>
    %9 = arith.mulf %8, %8 : vector<8x8x128xf32>
    %c1 = arith.constant 1 : index
    %c0_5 = arith.constant 0 : index
    %c0_6 = arith.constant 0 : index
    %10 = vector.load %arg1[%c1, %c0_5, %c0_6] : memref<3x8x128xf32, #tpu.memory_space<vmem>>, vector<1x8x128xf32>
    %11 = vector.shape_cast %10 : vector<1x8x128xf32> to vector<8x128xf32>
    %12 = vector.shape_cast %11 : vector<8x128xf32> to vector<8x1x128xf32>
    %c1_7 = arith.constant 1 : index
    %c0_8 = arith.constant 0 : index
    %c0_9 = arith.constant 0 : index
    %13 = vector.load %arg2[%c1_7, %c0_8, %c0_9] : memref<3x8x128xf32, #tpu.memory_space<vmem>>, vector<1x8x128xf32>
    %14 = vector.shape_cast %13 : vector<1x8x128xf32> to vector<8x128xf32>
    %15 = vector.shape_cast %14 : vector<8x128xf32> to vector<1x8x128xf32>
    %16 = vector.broadcast %12 : vector<8x1x128xf32> to vector<8x8x128xf32>
    %17 = vector.broadcast %15 : vector<1x8x128xf32> to vector<8x8x128xf32>
    %18 = arith.subf %16, %17 : vector<8x8x128xf32>
    %19 = arith.mulf %18, %18 : vector<8x8x128xf32>
    %20 = arith.addf %9, %19 : vector<8x8x128xf32>
    %c2 = arith.constant 2 : index
    %c0_10 = arith.constant 0 : index
    %c0_11 = arith.constant 0 : index
    %21 = vector.load %arg1[%c2, %c0_10, %c0_11] : memref<3x8x128xf32, #tpu.memory_space<vmem>>, vector<1x8x128xf32>
    %22 = vector.shape_cast %21 : vector<1x8x128xf32> to vector<8x128xf32>
    %23 = vector.shape_cast %22 : vector<8x128xf32> to vector<8x1x128xf32>
    %c2_12 = arith.constant 2 : index
    %c0_13 = arith.constant 0 : index
    %c0_14 = arith.constant 0 : index
    %24 = vector.load %arg2[%c2_12, %c0_13, %c0_14] : memref<3x8x128xf32, #tpu.memory_space<vmem>>, vector<1x8x128xf32>
    %25 = vector.shape_cast %24 : vector<1x8x128xf32> to vector<8x128xf32>
    %26 = vector.shape_cast %25 : vector<8x128xf32> to vector<1x8x128xf32>
    %27 = vector.broadcast %23 : vector<8x1x128xf32> to vector<8x8x128xf32>
    %28 = vector.broadcast %26 : vector<1x8x128xf32> to vector<8x8x128xf32>
    %29 = arith.subf %27, %28 : vector<8x8x128xf32>
    %30 = arith.mulf %29, %29 : vector<8x8x128xf32>
    %31 = arith.addf %20, %30 : vector<8x8x128xf32>
    %32 = math.sqrt %31 : vector<8x8x128xf32>
    %c0_15 = arith.constant 0 : index
    %c0_16 = arith.constant 0 : index
    %c0_17 = arith.constant 0 : index
    %33 = vector.load %arg3[%c0_15, %c0_16, %c0_17] : memref<8x8x128xf32, #tpu.memory_space<vmem>>, vector<8x8x128xf32>
    tpu.vector_store %arg3[%c0_15, %c0_16, %c0_17], %32 {strides = array<i32>} : memref<8x8x128xf32, #tpu.memory_space<vmem>>, vector<8x8x128xf32>,
    return
  }
  func.func @transform_0(%arg0: i32) -> (i32, i32, i32) {
    %c0_i32 = arith.constant 0 : i32
    %c0_i32_0 = arith.constant 0 : i32
    %c0_i32_1 = arith.constant 0 : i32
    return %c0_i32, %c0_i32_0, %arg0 : i32, i32, i32
  }
  func.func @transform_1(%arg0: i32) -> (i32, i32, i32) {
    %c0_i32 = arith.constant 0 : i32
    %c0_i32_0 = arith.constant 0 : i32
    %c0_i32_1 = arith.constant 0 : i32
    return %c0_i32, %c0_i32_0, %arg0 : i32, i32, i32
  }
  func.func @transform_2(%arg0: i32) -> (i32, i32, i32) {
    %c0_i32 = arith.constant 0 : i32
    %c0_i32_0 = arith.constant 0 : i32
    %c0_i32_1 = arith.constant 0 : i32
    return %c0_i32, %c0_i32_0, %arg0 : i32, i32, i32
  }
}

</mosaic_0001>

<bundles_post_ra>
// kernel: tpu_custom_call.1
= control target key start
LH: loop header
LB: loop body
LE: loop exit
PB: predicated region body
PF: predicated region fallthrough
CT: control target
= control target key end

     0   :  { %7 = vsyncpa [#allocation3], 0  ;;  %s777_s0 = inlined_call_operand.hbm [shape: f32[3,8,128], index: 0, kind: input, shape index: {}]   ;;  %s778_s1 = inlined_call_operand.hbm [shape: f32[3,8,128], index: 1, kind: input, shape index: {}]   ;;  %s779_s2 = inlined_call_operand.hbm [shape: f32[8,8,128], index: 2, kind: output, shape index: {}]  }
   0x1   :  { %8 = vsyncpa [#allocation6], 0 }
   0x2   :  { %9 = vsyncpa [#allocation4], 0  ;;  %s563_s9 = smov [#allocation2]   ;;  %s491_s13 = scalar_lea.hbm %s777_s0, 384 }
   0x3   :  { %s15_s10 = sshll.u32 %s563_s9, 4  ;;  %p492_p0 = scmp.ne.s32.totalorder %s777_s0, %s491_s13  ;;  %s16_s10 = int_to_ptr.vmem [resolvable:$true] %s15_s10 }
   0x4   :  { %p495_p1 = scmp.lt.u32.totalorder %s491_s13, %s777_s0 }
   0x6   :  { %p497_p2 = pnand %p495_p1, %p492_p0 }
   0x8   :  { %500 = shalt.err (!%p497_p2)
}
   0x9   :  { %s501_s18 = scalar_lea.vmem %s16_s10, 384  ;;  %p506_p4 = scmp.lt.s32.totalorder %s16_s10, %s16_s10 }
   0xa   :  { %p502_p3 = scmp.ne.s32.totalorder %s16_s10, %s501_s18  ;;  %p507_p5 = scmp.lt.s32.totalorder %s501_s18, %s501_s18 }
   0xc   :  { %p508_p6 = por %p507_p5, %p506_p4 }
   0xe   :  { %p509_p7 = pnand %p508_p6, %p502_p3 }
  0x10   :  { %512 = shalt.err (!%p509_p7)
}
  0x11   :  { %s564_s19 = smov 128   ;;  %s565_s20 = smov 8  }
  0x12   :  { %21 = dma.hbm_to_vmem [thread:$0]  %s777_s0, 384, %s16_s10, [#allocation3], %s564_s19, %s564_s19, %s565_s20  }
  0x13   :  { %s566_s23 = smov [#allocation5]   ;;  %s513_s27 = scalar_lea.hbm %s778_s1, 384 }
  0x14   :  { %s27_s24 = sshll.u32 %s566_s23, 4  ;;  %p514_p8 = scmp.ne.s32.totalorder %s778_s1, %s513_s27  ;;  %s28_s24 = int_to_ptr.vmem [resolvable:$true] %s27_s24 }
  0x15   :  { %p517_p9 = scmp.lt.u32.totalorder %s513_s27, %s778_s1 }
  0x17   :  { %p519_p10 = pnand %p517_p9, %p514_p8 }
  0x19   :  { %522 = shalt.err (!%p519_p10)
}
  0x1a   :  { %s523_s4 = scalar_lea.vmem %s28_s24, 384  ;;  %p528_p12 = scmp.lt.s32.totalorder %s28_s24, %s28_s24 }
  0x1b   :  { %p524_p11 = scmp.ne.s32.totalorder %s28_s24, %s523_s4  ;;  %p529_p13 = scmp.lt.s32.totalorder %s523_s4, %s523_s4 }
  0x1d   :  { %p530_p0 = por %p529_p13, %p528_p12 }
  0x1f   :  { %p531_p1 = pnand %p530_p0, %p524_p11 }
  0x21   :  { %534 = shalt.err (!%p531_p1)
}
  0x22   :  { %33 = dma.hbm_to_vmem [thread:$0]  %s778_s1, 384, %s28_s24, [#allocation6], %s564_s19, %s564_s19, %s565_s20  }
  0x23   :  { %557 = dma.done.wait [#allocation3], 384  }
  0x24   :  { %558 = vsyncadd [#allocation3], 4294966912 }
  0x25   :  { %559 = dma.done.wait [#allocation6], 384  }
  0x26   :  { %560 = vsyncadd [#allocation6], 4294966912  ;;  %v46_v0 = vlaneseq  ;;  %v567_v1 = vmov 1966171168   ;;  %v40_v6 = vld [vmem:[#allocation2] sm:$0xff]  ;;  %v149_v7 = vld [vmem:[#allocation2 + $0x8] sm:$0xff] }
  0x27   :  { %v44_v2 = vunpack.c.l.s4 %v567_v1  ;;  %v620_v11 = vld [vmem:[#allocation2 + $0x10] sm:$0xff]  ;;  %v42_v12 = vcombine.high %v40_v6, %v40_v6  ;;  %v626_v18 = vld [vmem:[#allocation5] sm:$0xff]  ;;  %v628_v19 = vld [vmem:[#allocation5 + $0x8] sm:$0xff]  ;;  %v151_v23 = vcombine.high %v149_v7, %v149_v7  ;;  %s568_s1 = smov [#allocation7]  }
  0x28   :  { %v47_v3 = vshrl.u32 %v46_v0, 7  ;;  %v636_v26 = vld [vmem:[#allocation5 + $0x10] sm:$0xff]  ;;  %v269_v63 = vcombine.high %v620_v11, %v620_v11  ;;  %s453_s6 = sshll.u32 %s568_s1, 4  ;;  %s454_s6 = int_to_ptr.vmem [resolvable:$true] %s453_s6 }
  0x29   :  { %v45_v4 = vunpack.c.0.s8 %v44_v2  ;;  %s535_s7 = scalar_lea.vmem %s454_s6, 1024  ;;  %p540_p3 = scmp.lt.s32.totalorder %s454_s6, %s454_s6 }
  0x2a   :  { %v617_v9 = vsub.s32 0, %v47_v3  ;;  %p536_p2 = scmp.ne.s32.totalorder %s454_s6, %s535_s7  ;;  %p541_p4 = scmp.lt.s32.totalorder %s535_s7, %s535_s7 }
  0x2b   :  { %v614_v5 = vsub.s32 %v45_v4, %v47_v3 }
  0x2c   :  { %p542_p5 = por %p541_p4, %p540_p3 }
  0x2d   :  { %v49_v8 = vrot.slane %v40_v6, %v614_v5  ;;  %v158_v10 = vrot.slane %v149_v7, %v614_v5  ;;  %v276_v13 = vrot.slane %v620_v11, %v614_v5  ;;  %v632_v22 = vrot.slane %v42_v12, %v614_v5 }
  0x2e   :  { %v165_v1 = vrot.slane %v151_v23, %v614_v5  ;;  %v283_v12 = vrot.slane %v269_v63, %v614_v5  ;;  %p543_p6 = pnand %p542_p5, %p536_p2 }
  0x2f   :  { %v65_v14 = vrot.slane %v49_v8, %v614_v5  ;;  %v174_v15 = vrot.slane %v158_v10, %v614_v5  ;;  %v57_v16 = vcombine.high %v49_v8, %v49_v8  ;;  %v166_v17 = vcombine.high %v158_v10, %v158_v10 }
  0x30   :  { %v292_v20 = vrot.slane %v276_v13, %v614_v5  ;;  %v284_v21 = vcombine.high %v276_v13, %v276_v13  ;;  %v72_v0 = vrot.slane %v632_v22, %v614_v5  ;;  %v674_v11 = vrot.slane %v165_v1, %v614_v5 }
  0x31   :  { %v95_v24 = vrot.slane %v65_v14, %v617_v9  ;;  %v205_v25 = vrot.slane %v174_v15, %v617_v9  ;;  %v79_v27 = vrot.slane %v57_v16, %v614_v5  ;;  %v188_v28 = vrot.slane %v166_v17, %v614_v5 }
  0x32   :  { %v323_v29 = vrot.slane %v292_v20, %v617_v9  ;;  %v306_v30 = vrot.slane %v284_v21, %v614_v5  ;;  %v87_v31 = vcombine.high %v65_v14, %v65_v14  ;;  %v196_v32 = vcombine.high %v174_v15, %v174_v15 }
  0x33   :  { %v132_v33 = vsub.f32 %v95_v24, %v626_v18  ;;  %v242_v34 = vsub.f32 %v205_v25, %v628_v19  ;;  %v99_v35 = vrot.slane %v79_v27, %v617_v9  ;;  %v209_v36 = vrot.slane %v188_v28, %v617_v9 }
  0x34   :  { %v360_v37 = vsub.f32 %v323_v29, %v636_v26  ;;  %v327_v38 = vrot.slane %v306_v30, %v617_v9  ;;  %v103_v39 = vrot.slane %v87_v31, %v617_v9  ;;  %v213_v40 = vrot.slane %v196_v32, %v617_v9 }
  0x35   :  { %v140_v41 = vmul.f32 %v132_v33, %v132_v33  ;;  %v250_v42 = vmul.f32 %v242_v34, %v242_v34  ;;  %v133_v43 = vsub.f32 %v99_v35, %v626_v18  ;;  %v243_v44 = vsub.f32 %v209_v36, %v628_v19 }
  0x36   :  { %v368_v45 = vmul.f32 %v360_v37, %v360_v37  ;;  %v361_v46 = vsub.f32 %v327_v38, %v636_v26  ;;  %v134_v47 = vsub.f32 %v103_v39, %v626_v18  ;;  %v244_v48 = vsub.f32 %v213_v40, %v628_v19 }
  0x37   :  { %v258_v49 = vadd.f32 %v250_v42, %v140_v41  ;;  %v141_v50 = vmul.f32 %v133_v43, %v133_v43  ;;  %v251_v51 = vmul.f32 %v243_v44, %v243_v44  ;;  %v314_v52 = vcombine.high %v292_v20, %v292_v20 }
  0x38   :  { %v369_v53 = vmul.f32 %v361_v46, %v361_v46  ;;  %v142_v54 = vmul.f32 %v134_v47, %v134_v47  ;;  %v252_v55 = vmul.f32 %v244_v48, %v244_v48  ;;  %v89_v56 = vcombine.high %v79_v27, %v79_v27 }
  0x39   :  { %v655_v57 = vadd.f32 %v368_v45, %v258_v49  ;;  %v259_v58 = vadd.f32 %v251_v51, %v141_v50  ;;  %v331_v59 = vrot.slane %v314_v52, %v617_v9  ;;  %v198_v60 = vcombine.high %v188_v28, %v188_v28 }
  0x3a   :  { %v107_v61 = vrot.slane %v89_v56, %v617_v9  ;;  %v316_v62 = vcombine.high %v306_v30, %v306_v30  ;;  %v260_v7 = vadd.f32 %v252_v55, %v142_v54  ;;  %v111_v10 = vrot.slane %v72_v0, %v617_v9 }
  0x3b   :  { %475 = vrsqrt.f32 %v655_v57  ;;  %v665_v2 = vadd.f32 %v369_v53, %v259_v58  ;;  %v362_v3 = vsub.f32 %v331_v59, %v636_v26  ;;  %v217_v6 = vrot.slane %v198_v60, %v617_v9 }
  0x3c   :  { %v135_v4 = vsub.f32 %v107_v61, %v626_v18  ;;  %v335_v8 = vrot.slane %v316_v62, %v617_v9  ;;  %v136_v17 = vsub.f32 %v111_v10, %v626_v18  ;;  %v221_v20 = vrot.slane %v674_v11, %v617_v9 }
  0x3d   :  { %477 = vrsqrt.f32 %v665_v2  ;;  %v370_v13 = vmul.f32 %v362_v3, %v362_v3  ;;  %v245_v15 = vsub.f32 %v217_v6, %v628_v19  ;;  %v683_v21 = vrot.slane %v283_v12, %v614_v5 }
  0x3e   :  { %v143_v14 = vmul.f32 %v135_v4, %v135_v4  ;;  %v363_v16 = vsub.f32 %v335_v8, %v636_v26  ;;  %v58_v23 = vcombine.high %v632_v22, %v632_v22  ;;  %v167_v28 = vcombine.high %v165_v1, %v165_v1 }
  0x3f   :  { %v687_v24 = vadd.f32 %v370_v13, %v260_v7  ;;  %v253_v25 = vmul.f32 %v245_v15, %v245_v15  ;;  %v144_v29 = vmul.f32 %v136_v17, %v136_v17  ;;  %v246_v30 = vsub.f32 %v221_v20, %v628_v19 }
  0x40   :  { %v371_v27 = vmul.f32 %v363_v16, %v363_v16  ;;  %v339_v31 = vrot.slane %v683_v21, %v617_v9  ;;  %v86_v32 = vrot.slane %v58_v23, %v614_v5  ;;  %vm386_vm0 = vcmp.eq.f32.partialorder %v655_v57, inf }
  0x41   :  { %vm388_vm1 = vcmp.eq.f32.partialorder %v655_v57, 0.0  ;;  %v389_v33 = vand.u32 2147483648, %v655_v57  ;;  %479 = vrsqrt.f32 %v687_v24  ;;  %v261_v22 = vadd.f32 %v253_v25, %v143_v14 }
  0x42   :  { %v254_v34 = vmul.f32 %v246_v30, %v246_v30  ;;  %v364_v35 = vsub.f32 %v339_v31, %v636_v26  ;;  %v115_v36 = vrot.slane %v86_v32, %v617_v9  ;;  %vm393_vm2 = vcmp.eq.f32.partialorder %v665_v2, inf }
  0x43   :  { %v195_v38 = vrot.slane %v167_v28, %v614_v5  ;;  %v285_v39 = vcombine.high %v283_v12, %v283_v12  ;;  %v88_v40 = vcombine.high %v72_v0, %v72_v0  ;;  %v702_v42 = vadd.f32 %v371_v27, %v261_v22 }
  0x44   :  { %v262_v43 = vadd.f32 %v254_v34, %v144_v29  ;;  %v372_v44 = vmul.f32 %v364_v35, %v364_v35  ;;  %vm395_vm3 = vcmp.eq.f32.partialorder %v665_v2, 0.0  ;;  %v137_v45 = vsub.f32 %v115_v36, %v626_v18 }
  0x45   :  { %v476_v37 = vpop.eup %475  ;;  %v225_v46 = vrot.slane %v195_v38, %v617_v9  ;;  %v119_v47 = vrot.slane %v88_v40, %v617_v9  ;;  %v396_v50 = vand.u32 2147483648, %v665_v2  ;;  %481 = vrsqrt.f32 %v702_v42 }
  0x46   :  { %v385_v41 = vmul.f32 %v476_v37, %v655_v57  ;;  %v313_v51 = vrot.slane %v285_v39, %v614_v5  ;;  %v717_v54 = vadd.f32 %v372_v44, %v262_v43  ;;  %v197_v55 = vcombine.high %v674_v11, %v674_v11 }
  0x47   :  { %v478_v48 = vpop.eup %477  ;;  %v145_v56 = vmul.f32 %v137_v45, %v137_v45  ;;  %v247_v58 = vsub.f32 %v225_v46, %v628_v19  ;;  %vm400_vm4 = vcmp.eq.f32.partialorder %v687_v24, inf  ;;  %vm402_vm5 = vcmp.eq.f32.partialorder %v687_v24, 0.0 }
  0x48   :  { %v387_v49 = vsel %vm386_vm0, %v655_v57, %v385_v41  ;;  %v392_v53 = vmul.f32 %v478_v48, %v665_v2  ;;  %v343_v59 = vrot.slane %v313_v51, %v617_v9  ;;  %483 = vrsqrt.f32 %v717_v54 }
  0x49   :  { %v390_v52 = vsel %vm388_vm1, %v389_v33, %v387_v49  ;;  %v138_v57 = vsub.f32 %v119_v47, %v626_v18  ;;  %v255_v61 = vmul.f32 %v247_v58, %v247_v58  ;;  %v403_v0 = vand.u32 2147483648, %v687_v24 }
  0x4a   :  { %440 = vst [vmem:[#allocation7] sm:$0xff] %v390_v52  ;;  %v394_v5 = vsel %vm393_vm2, %v665_v2, %v392_v53  ;;  %v365_v62 = vsub.f32 %v343_v59, %v636_v26  ;;  %v229_v1 = vrot.slane %v197_v55, %v617_v9  ;;  %v315_v3 = vcombine.high %v683_v21, %v683_v21 }
  0x4b   :  { %v397_v60 = vsel %vm395_vm3, %v396_v50, %v394_v5  ;;  %v480_v63 = vpop.eup %479  ;;  %v90_v4 = vcombine.high %v86_v32, %v86_v32  ;;  %v263_v7 = vadd.f32 %v255_v61, %v145_v56  ;;  %v199_v8 = vcombine.high %v195_v38, %v195_v38 }
  0x4c   :  { %441 = vst [vmem:[#allocation7 + $0x8] sm:$0xff] %v397_v60  ;;  %v399_v6 = vmul.f32 %v480_v63, %v687_v24  ;;  %v373_v2 = vmul.f32 %v365_v62, %v365_v62  ;;  %v146_v10 = vmul.f32 %v138_v57, %v138_v57  ;;  %v248_v11 = vsub.f32 %v229_v1, %v628_v19 }
  0x4d   :  { %v347_v12 = vrot.slane %v315_v3, %v617_v9  ;;  %v123_v13 = vrot.slane %v90_v4, %v617_v9  ;;  %v233_v16 = vrot.slane %v199_v8, %v617_v9  ;;  %v317_v17 = vcombine.high %v313_v51, %v313_v51 }
  0x4e   :  { %v401_v14 = vsel %vm400_vm4, %v687_v24, %v399_v6  ;;  %v381_v15 = vadd.f32 %v373_v2, %v263_v7  ;;  %v256_v21 = vmul.f32 %v248_v11, %v248_v11  ;;  %vm407_vm6 = vcmp.eq.f32.partialorder %v702_v42, inf }
  0x4f   :  { %v404_v20 = vsel %vm402_vm5, %v403_v0, %v401_v14  ;;  %v366_v23 = vsub.f32 %v347_v12, %v636_v26  ;;  %v139_v25 = vsub.f32 %v123_v13, %v626_v18  ;;  %v482_v27 = vpop.eup %481  ;;  %v410_v28 = vand.u32 2147483648, %v702_v42 }
  0x50   :  { %442 = vst [vmem:[#allocation7 + $0x10] sm:$0xff] %v404_v20  ;;  %485 = vrsqrt.f32 %v381_v15  ;;  %v406_v29 = vmul.f32 %v482_v27, %v702_v42  ;;  %vm409_vm7 = vcmp.eq.f32.partialorder %v702_v42, 0.0  ;;  %v264_v30 = vadd.f32 %v256_v21, %v146_v10 }
  0x51   :  { %v374_v31 = vmul.f32 %v366_v23, %v366_v23  ;;  %vm414_vm8 = vcmp.eq.f32.partialorder %v717_v54, inf  ;;  %v147_v24 = vmul.f32 %v139_v25, %v139_v25  ;;  %v249_v32 = vsub.f32 %v233_v16, %v628_v19 }
  0x52   :  { %v351_v18 = vrot.slane %v317_v17, %v617_v9  ;;  %v484_v33 = vpop.eup %483  ;;  %v408_v22 = vsel %vm407_vm6, %v702_v42, %v406_v29  ;;  %vm416_vm9 = vcmp.eq.f32.partialorder %v717_v54, 0.0  ;;  %v417_v34 = vand.u32 2147483648, %v717_v54 }
  0x53   :  { %v382_v35 = vadd.f32 %v374_v31, %v264_v30  ;;  %v411_v36 = vsel %vm409_vm7, %v410_v28, %v408_v22  ;;  %v413_v37 = vmul.f32 %v484_v33, %v717_v54  ;;  %v257_v38 = vmul.f32 %v249_v32, %v249_v32 }
  0x54   :  { %v367_v39 = vsub.f32 %v351_v18, %v636_v26  ;;  %443 = vst [vmem:[#allocation7 + $0x18] sm:$0xff] %v411_v36  ;;  %vm421_vm10 = vcmp.eq.f32.partialorder %v381_v15, inf  ;;  %v424_v44 = vand.u32 2147483648, %v381_v15  ;;  %vm423_vm11 = vcmp.eq.f32.partialorder %v381_v15, 0.0 }
  0x55   :  { %487 = vrsqrt.f32 %v382_v35  ;;  %v415_v19 = vsel %vm414_vm8, %v717_v54, %v413_v37  ;;  %v265_v40 = vadd.f32 %v257_v38, %v147_v24  ;;  %vm428_vm12 = vcmp.eq.f32.partialorder %v382_v35, inf }
  0x56   :  { %v375_v9 = vmul.f32 %v367_v39, %v367_v39  ;;  %v418_v41 = vsel %vm416_vm9, %v417_v34, %v415_v19  ;;  %v431_v26 = vand.u32 2147483648, %v382_v35  ;;  %vm430_vm13 = vcmp.eq.f32.partialorder %v382_v35, 0.0 }
  0x57   :  { %444 = vst [vmem:[#allocation7 + $0x20] sm:$0xff] %v418_v41 }
  0x58   :  { %v383_v42 = vadd.f32 %v375_v9, %v265_v40 }
  0x5a   :  { %v486_v43 = vpop.eup %485  ;;  %489 = vrsqrt.f32 %v383_v42  ;;  %vm435_vm14 = vcmp.eq.f32.partialorder %v383_v42, inf  ;;  %v438_v53 = vand.u32 2147483648, %v383_v42  ;;  %vm437_vm15 = vcmp.eq.f32.partialorder %v383_v42, 0.0 }
  0x5b   :  { %v420_v45 = vmul.f32 %v486_v43, %v381_v15 }
  0x5d   :  { %v422_v46 = vsel %vm421_vm10, %v381_v15, %v420_v45 }
  0x5e   :  { %v425_v47 = vsel %vm423_vm11, %v424_v44, %v422_v46 }
  0x5f   :  { %v488_v48 = vpop.eup %487  ;;  %445 = vst [vmem:[#allocation7 + $0x28] sm:$0xff] %v425_v47 }
  0x60   :  { %v427_v49 = vmul.f32 %v488_v48, %v382_v35 }
  0x62   :  { %v429_v50 = vsel %vm428_vm12, %v382_v35, %v427_v49 }
  0x63   :  { %v432_v51 = vsel %vm430_vm13, %v431_v26, %v429_v50 }
  0x64   :  { %v490_v52 = vpop.eup %489  ;;  %446 = vst [vmem:[#allocation7 + $0x30] sm:$0xff] %v432_v51 }
  0x65   :  { %v434_v54 = vmul.f32 %v490_v52, %v383_v42 }
  0x67   :  { %v436_v55 = vsel %vm435_vm14, %v383_v42, %v434_v54 }
  0x68   :  { %v439_v56 = vsel %vm437_vm15, %v438_v53, %v436_v55 }
  0x69   :  { %447 = vst [vmem:[#allocation7 + $0x38] sm:$0xff] %v439_v56 }
  0x6a   :  { %546 = shalt.err (!%p543_p6)
}
  0x6b   :  { %s547_s10 = scalar_lea.hbm %s779_s2, 1024 }
  0x6c   :  { %p548_p7 = scmp.ne.s32.totalorder %s779_s2, %s547_s10  ;;  %p551_p8 = scmp.lt.u32.totalorder %s547_s10, %s779_s2 }
  0x6e   :  { %p553_p9 = pnand %p551_p8, %p548_p7 }
  0x70   :  { %556 = shalt.err (!%p553_p9)
}
  0x71   :  { %459 = dma.vmem_to_hbm [thread:$0]  %s454_s6, 1024, %s779_s2, [#allocation4], %s564_s19, %s564_s19, %s565_s20  }
  0x72   :  { %561 = dma.done.wait [#allocation4], 1024  }
  0x73   :  { %562 = vsyncadd [#allocation4], 4294966272 }
  0x74   :  { %463 = vsyncpa [#allocation3], 1 }
  0x75   :  { %464 = vsyncpa [#allocation6], 1 }
  0x76   :  { %465 = vsyncpa [#allocation4], 1 }

</bundles_post_ra>
